<compile_context>
chip_gen: v6e
topology: v6e:2x2x1
jax: 0.10.0
libtpu: 0.0.40
codegen_flags: <defaults>
</compile_context>

<pallas_src>
import functools

import jax
import jax.numpy as jnp
from jax.experimental import pallas as pl
from jax.experimental.pallas import tpu as pltpu

EPS = 1e-6


def _round_down(v, m):
    return (v // m) * m


def _pick_tiles(R, T, itemsize, target_bytes, row_cap):
    """Pick an (8/16, 128)-aligned tile whose byte size is ~target_bytes."""
    sub = 8 if itemsize >= 4 else 16          # sublane pack: f32 -> 8, bf16 -> 16
    # Row tile: full R if small, otherwise a packed multiple capped at row_cap.
    if R <= row_cap:
        tr = R
    else:
        tr = max(sub, _round_down(row_cap, sub))
        if tr >= R:
            tr = R
    # Time tile: spend the byte budget along T (lane axis), 128-aligned.
    tt_budget = max(128, target_bytes // max(1, tr * itemsize))
    tt = T if T <= tt_budget else max(128, _round_down(tt_budget, 128))
    # If T is short and rows were capped, spend the leftover budget on more rows.
    if tt == T and tr < R:
        tr_budget = target_bytes // max(1, T * itemsize)
        tr = R if R <= tr_budget else max(sub, _round_down(tr_budget, sub))
        if tr >= R:
            tr = R
    if tr != R:
        assert tr % sub == 0, "row tile must match the sublane pack"
    if tt != T:
        assert tt % 128 == 0, "time tile must be a multiple of 128"
    return tr, tt


def _snake_beta_kernel(x_ref, p_ref, o_ref):
    # x_ref / o_ref: (tr, tt) in the I/O dtype.
    # p_ref: (tr, 2) float32; [:, 0] = 2*exp(alpha), [:, 1] = 0.5/(exp(beta)+eps).
    x = x_ref[...].astype(jnp.float32)
    two_alpha = p_ref[:, 0:1]
    half_inv_beta = p_ref[:, 1:2]
    c = jnp.cos(x * two_alpha)                # sin(a x)^2 == (1 - cos(2 a x)) / 2
    o_ref[...] = (x + half_inv_beta * (1.0 - c)).astype(o_ref.dtype)


@functools.partial(
    jax.jit,
    static_argnames=("target_block_bytes", "row_cap"),
    donate_argnums=(0,),
)
def snake_beta(x, alpha_param, beta_param, *,
               target_block_bytes=4 * 1024 * 1024, row_cap=512):
    """SnakeBeta activation.

    x: (B, C, T) float32 or bfloat16 (donated; output reuses its HBM buffer)
    alpha_param, beta_param: (C,) float32 log-scale parameters (logscale=True)
    """
    B, C, T = x.shape
    R = B * C
    itemsize = jnp.dtype(x.dtype).itemsize

    # Per-channel transcendentals hoisted OUT of the kernel (tiny (C,) vectors),
    # packed into a single (R, 2) array -> one param DMA per channel-block.
    two_alpha = 2.0 * jnp.exp(alpha_param.astype(jnp.float32))
    half_inv_beta = 0.5 / (jnp.exp(beta_param.astype(jnp.float32)) + EPS)
    params = jnp.tile(jnp.stack([two_alpha, half_inv_beta], axis=-1), (B, 1))

    x2d = x.reshape(R, T)                     # contiguous reshape: free in XLA

    tr, tt = _pick_tiles(R, T, itemsize, target_block_bytes, row_cap)
    grid = (pl.cdiv(R, tr), pl.cdiv(T, tt))

    # Double-buffered in + out tiles, lane-padded param tiles, plus slack.
    tile_bytes = tr * tt * itemsize
    param_bytes = ((tr + 7) // 8) * 8 * 128 * 4
    vmem_limit = int(min(48 * 1024 * 1024,
                         max(16 * 1024 * 1024,
                             4 * tile_bytes + 2 * param_bytes + (2 << 20))))

    y2d = pl.pallas_call(
        _snake_beta_kernel,
        out_shape=jax.ShapeDtypeStruct((R, T), x.dtype),
        grid_spec=pltpu.PrefetchScalarGridSpec(
            num_scalar_prefetch=0,
            grid=grid,
            in_specs=[
                pl.BlockSpec((tr, tt), lambda r, t: (r, t)),
                pl.BlockSpec((tr, 2), lambda r, t: (r, 0)),
            ],
            out_specs=pl.BlockSpec((tr, tt), lambda r, t: (r, t)),
        ),
        # Output reuses x's HBM buffer (x is dead after this op in the generator).
        input_output_aliases={0: 0},
        compiler_params=pltpu.CompilerParams(
            # Fully elementwise: both grid axes independent (megacore OK).
            dimension_semantics=("parallel", "parallel"),
            vmem_limit_bytes=vmem_limit,
        ),
    )(x2d, params)
    return y2d.reshape(B, C, T)


def snake_beta_ref(x, alpha_param, beta_param):
    alpha = jnp.exp(alpha_param)[None, :, None]
    beta = jnp.exp(beta_param)[None, :, None]
    return x + 1.0 / (beta + EPS) * jnp.sin(x * alpha) ** 2


if __name__ == "__main__":
    key = jax.random.PRNGKey(0)

    def check(B, C, T, dtype, tol, **kw):
        kx, ka, kb = jax.random.split(jax.random.fold_in(key, B * 7 + C * 1000 + T), 3)
        x = jax.random.normal(kx, (B, C, T), dtype=jnp.float32).astype(dtype)
        # Module __init__ (logscale=True): alpha = zeros(C)+a0, beta = zeros(C)+b0.
        # Use small deterministic perturbations so exp() is nontrivial.
        alpha_param = 0.1 * jax.random.normal(ka, (C,), dtype=jnp.float32)
        beta_param = 0.1 * jax.random.normal(kb, (C,), dtype=jnp.float32)

        # Compute the reference first: x is donated (consumed) by the kernel call.
        y_ref = snake_beta_ref(x.astype(jnp.float32), alpha_param, beta_param)
        y = jax.block_until_ready(snake_beta(x, alpha_param, beta_param, **kw))
        assert y.shape == (B, C, T) and y.dtype == dtype
        assert jnp.allclose(y.astype(jnp.float32), y_ref, atol=tol, rtol=tol), (
            f"mismatch B={B} C={C} T={T} dtype={dtype}"
        )

    # Small shape consistent with the module (single full-array block).
    check(2, 4, 16, jnp.float32, 1e-5)
    # Tiled path: tiny byte budget forces an (8,128)-aligned multi-block grid.
    check(2, 16, 512, jnp.float32, 1e-5, target_block_bytes=8 * 128 * 4, row_cap=8)
    # Non-divisible time dim -> remainder block handled via masked writeback.
    check(2, 16, 320, jnp.float32, 1e-5, target_block_bytes=8 * 128 * 4, row_cap=8)
    # bf16 I/O, tiled: channel tile is a multiple of 16 (bf16 sublane packing).
    check(2, 16, 256, jnp.bfloat16, 1e-2, target_block_bytes=16 * 128 * 2, row_cap=16)
    # bf16 I/O, single full block (math in f32 in-register).
    check(2, 4, 16, jnp.bfloat16, 1e-2)

    print("KERNEL_OK")
</pallas_src>

<mosaic_0001>
module attributes {stable_mosaic.version = 11 : i64} {
  func.func @_snake_beta_kernel(%arg0: i32, %arg1: i32, %arg2: memref<8x16xf32, #tpu.memory_space<vmem>>, %arg3: memref<8x2xf32, #tpu.memory_space<vmem>>, %arg4: memref<8x16xf32, #tpu.memory_space<vmem>>) attributes {dimension_semantics = [#tpu.dimension_semantics<parallel>, #tpu.dimension_semantics<parallel>], iteration_bounds = array<i64: 1, 1>, scalar_prefetch = 0 : i64, scratch_operands = 0 : i64, tpu.core_type = #tpu.core_type<tc>, window_params = [{transform_indices = @transform_0, window_bounds = array<i64: 8, 16>}, {transform_indices = @transform_1, window_bounds = array<i64: 8, 2>}, {transform_indices = @transform_2, window_bounds = array<i64: 8, 16>}]} {
    %c0 = arith.constant 0 : index
    %c0_0 = arith.constant 0 : index
    %0 = vector.load %arg2[%c0, %c0_0] : memref<8x16xf32, #tpu.memory_space<vmem>>, vector<8x16xf32>
    %c0_1 = arith.constant 0 : index
    %c0_2 = arith.constant 0 : index
    %1 = vector.load %arg3[%c0_1, %c0_2] : memref<8x2xf32, #tpu.memory_space<vmem>>, vector<8x1xf32>
    %c0_3 = arith.constant 0 : index
    %c1 = arith.constant 1 : index
    %2 = vector.load %arg3[%c0_3, %c1] : memref<8x2xf32, #tpu.memory_space<vmem>>, vector<8x1xf32>
    %3 = vector.broadcast %1 : vector<8x1xf32> to vector<8x16xf32>
    %4 = arith.mulf %0, %3 : vector<8x16xf32>
    %5 = math.cos %4 : vector<8x16xf32>
    %cst = arith.constant 1.000000e+00 : f32
    %6 = vector.broadcast %cst : f32 to vector<8x16xf32>
    %7 = arith.subf %6, %5 : vector<8x16xf32>
    %8 = vector.broadcast %2 : vector<8x1xf32> to vector<8x16xf32>
    %9 = arith.mulf %8, %7 : vector<8x16xf32>
    %10 = arith.addf %0, %9 : vector<8x16xf32>
    %c0_4 = arith.constant 0 : index
    %c0_5 = arith.constant 0 : index
    %11 = vector.load %arg4[%c0_4, %c0_5] : memref<8x16xf32, #tpu.memory_space<vmem>>, vector<8x16xf32>
    tpu.vector_store %arg4[%c0_4, %c0_5], %10 {strides = array<i32>} : memref<8x16xf32, #tpu.memory_space<vmem>>, vector<8x16xf32>,
    return
  }
  func.func @transform_0(%arg0: i32, %arg1: i32) -> (i32, i32) {
    %c0_i32 = arith.constant 0 : i32
    return %arg0, %arg1 : i32, i32
  }
  func.func @transform_1(%arg0: i32, %arg1: i32) -> (i32, i32) {
    %c0_i32 = arith.constant 0 : i32
    %c0_i32_0 = arith.constant 0 : i32
    return %arg0, %c0_i32 : i32, i32
  }
  func.func @transform_2(%arg0: i32, %arg1: i32) -> (i32, i32) {
    %c0_i32 = arith.constant 0 : i32
    return %arg0, %arg1 : i32, i32
  }
}

</mosaic_0001>

<bundles_post_ra>
// kernel: snake_beta.1
= control target key start
LH: loop header
LB: loop body
LE: loop exit
PB: predicated region body
PF: predicated region fallthrough
CT: control target
= control target key end

     0   :  { %v157_v0 = vmov 0   ;;  %v158_v2 = vmov 1   ;;  %v159_v16 = vmov 683565275   ;;  %v160_v18 = vmov 2475754826   ;;  %s214_s1 = inlined_call_operand.vmem [shape: f32[8,2], index: 1, kind: input, shape index: {}]   ;;  %s215_s0 = inlined_call_operand.vmem [shape: f32[8,16], index: 0, kind: input, shape index: {}, may-alias: {0,2}]   ;;  %s216_s2 = inlined_call_operand.vmem [shape: f32[8,16], index: 2, kind: output, shape index: {}, may-alias: {0,2}]  }
   0x1   :  { %151 = vset.pattern.permute.xlu0 %v157_v0  ;;  %v12_v1 = vld [vmem:[%s214_s1] sm:$0xff]  ;;  %v161_v21 = vmov 2131351028   ;;  %v162_v24 = vmov 2102212464   ;;  %vm129_vm13 = vcmask 130048  }
   0x2   :  { %15 = vperm.xlu0 %151, %v12_v1   ;;  %v186_v3 = vld [vmem:[%s215_s0] sm:$0xff]  ;;  %v163_v27 = vmov 920167782   ;;  %v164_v30 = vmov 1326507024  }
   0x6   :  { %152 = vset.pattern.permute.xlu0 %v158_v2 }
   0x7   :  { %124 = vperm.xlu0 %152, %v12_v1  }
  0x7d   :  { %v16_v4 = vpop.permute.xlu0 %15 }
  0x7e   :  { %v189_v5 = vmul.f32 %v16_v4, %v186_v3 }
  0x80   :  { %v22_v6 = vand.u32 2139095040, %v189_v5  ;;  %v19_v10 = vand.u32 2147483647, %v189_v5  ;;  %vm21_vm7 = vcmp.lt.s32.totalorder %v189_v5, 0  ;;  %vm111_vm12 = vweird.f32 %v189_v5 }
  0x82   :  { %v23_v7 = vshrl.u32 %v22_v6, 23  ;;  %v26_v13 = vand.u32 8388607, %v19_v10  ;;  %vm20_vm8 = vcmp.le.f32.partialorder %v19_v10, 0.7853982 }
  0x84   :  { %v135_v8 = vadd.s32 4294967169, %v23_v7  ;;  %v27_v32 = vor.u32 8388608, %v26_v13 }
  0x86   :  { %v29_v9 = vadd.s32 1, %v135_v8  ;;  %v67_v46 = vshll.u32 %v27_v32, 8 }
  0x88   :  { %vm30_vm0 = vcmp.gt.s32.totalorder %v29_v9, 0 }
  0x89   :  { %v31_v11 = vsel %vm30_vm0, %v29_v9, 0 }
  0x8a   :  { %v33_v12 = vand.u32 31, %v31_v11  ;;  %v32_v15 = vshrl.u32 %v31_v11, 5 }
  0x8c   :  { %v34_v14 = vsub.s32 32, %v33_v12  ;;  %v36_v17 = vshll.u32 %v159_v16, %v33_v12  ;;  %v39_v19 = vshll.u32 %v160_v18, %v33_v12  ;;  %v42_v23 = vshll.u32 %v161_v21, %v33_v12 }
  0x8d   :  { %v45_v26 = vshll.u32 %v162_v24, %v33_v12  ;;  %v48_v29 = vshll.u32 %v163_v27, %v33_v12  ;;  %vm51_vm1 = vcmp.lt.s32.totalorder %v32_v15, 1  ;;  %vm54_vm2 = vcmp.lt.s32.totalorder %v32_v15, 4 }
  0x8e   :  { %v37_v20 = vshrl.u32 %v160_v18, %v34_v14  ;;  %v40_v22 = vshrl.u32 %v161_v21, %v34_v14  ;;  %v43_v25 = vshrl.u32 %v162_v24, %v34_v14  ;;  %v46_v28 = vshrl.u32 %v163_v27, %v34_v14 }
  0x8f   :  { %v49_v31 = vshrl.u32 %v164_v30, %v34_v14  ;;  %v35_v41 = vshrl.u32 %v159_v16, %v34_v14  ;;  %vm53_vm3 = vcmp.lt.s32.totalorder %v32_v15, 3  ;;  %vm52_vm4 = vcmp.lt.s32.totalorder %v32_v15, 2 }
  0x90   :  { %v38_v33 = vor.u32 %v37_v20, %v36_v17  ;;  %v41_v34 = vor.u32 %v40_v22, %v39_v19  ;;  %v44_v35 = vor.u32 %v43_v25, %v42_v23  ;;  %v47_v36 = vor.u32 %v46_v28, %v45_v26 }
  0x91   :  { %v50_v37 = vor.u32 %v49_v31, %v48_v29 }
  0x92   :  { %v56_v38 = vsel %vm54_vm2, %v44_v35, 2102212464  ;;  %v59_v39 = vsel %vm51_vm1, %v38_v33, %v41_v34  ;;  %v63_v40 = vsel %vm51_vm1, %v41_v34, %v44_v35  ;;  %v60_v42 = vsel %vm54_vm2, %v47_v36, 920167782 }
  0x93   :  { %v64_v43 = vsel %vm54_vm2, %v50_v37, 1326507024  ;;  %v61_v44 = vsel %vm53_vm3, %v44_v35, %v60_v42  ;;  %v55_v47 = vsel %vm51_vm1, %v35_v41, %v38_v33  ;;  %v57_v48 = vsel %vm53_vm3, %v41_v34, %v56_v38  ;;  %v125_v33 = vpop.permute.xlu0 %124 }
  0x94   :  { %v65_v45 = vsel %vm53_vm3, %v47_v36, %v64_v43  ;;  %v62_v49 = vsel %vm52_vm4, %v59_v39, %v61_v44  ;;  %v58_v55 = vsel %vm52_vm4, %v55_v47, %v57_v48 }
  0x95   :  { %v66_v50 = vsel %vm52_vm4, %v63_v40, %v65_v45  ;;  %v198_v53 = vmul.u32.u64.low %v67_v46, %v62_v49  ;;  %v199_v54 = vmul.u32.u64.high %v67_v46, %v62_v49, %v198_v53  ;;  %v74_v57 = vmul.u32 %v67_v46, %v58_v55 }
  0x96   :  { %v195_v51 = vmul.u32.u64.low %v67_v46, %v66_v50  ;;  %v196_v52 = vmul.u32.u64.high %v67_v46, %v66_v50, %v195_v51 }
  0x97   :  { %v77_v56 = vadd.s32 1, %v199_v54 }
  0x98   :  { %vm76_vm5 = vc.u32 %v196_v52, %v198_v53  ;;  %v75_v7 = vadd.s32 %v198_v53, %v196_v52 }
  0x99   :  { %v78_v58 = vsel %vm76_vm5, %v77_v56, %v199_v54 }
  0x9a   :  { %v79_v59 = vadd.s32 %v78_v58, %v74_v57 }
  0x9c   :  { %v80_v60 = vadd.s32 536870912, %v79_v59 }
  0x9e   :  { %v81_v61 = vshrl.u32 %v80_v60, 30 }
  0xa0   :  { %v82_v62 = vshll.u32 %v81_v61, 30  ;;  %v105_v23 = vsub.s32 4, %v81_v61 }
  0xa2   :  { %v83_v63 = vsub.s32 %v79_v59, %v82_v62  ;;  %v106_v24 = vsel %vm21_vm7, %v105_v23, %v81_v61 }
  0xa3   :  { %v108_v25 = vsel %vm20_vm8, 0, %v106_v24 }
  0xa4   :  { %v85_v0 = vsub.s32 0, %v83_v63  ;;  %v112_v26 = vand.u32 3, %v108_v25 }
  0xa6   :  { %v136_v1 = vmin.u32 %v85_v0, %v83_v63  ;;  %vm117_vm9 = vcmp.eq.s32.totalorder %v112_v26, 2  ;;  %vm114_vm10 = vcmp.eq.s32.totalorder %v112_v26, 0  ;;  %vm113_vm11 = vcmp.lt.s32.totalorder %v112_v26, 2 }
  0xa8   :  { %v87_v2 = vclz %v136_v1 }
  0xaa   :  { %v137_v4 = vadd.s32 4294967294, %v87_v2 }
  0xac   :  { %vm138_vm6 = vcmp.lt.s32.totalorder %v137_v4, 0 }
  0xad   :  { %v90_v6 = vsel %vm138_vm6, 0, %v137_v4 }
  0xae   :  { %v91_v8 = vsub.s32 32, %v90_v6  ;;  %v95_v9 = vsub.s32 4294967266, %v90_v6  ;;  %v92_v11 = vshll.u32 %v83_v63, %v90_v6 }
  0xb0   :  { %v93_v12 = vshrl.u32 %v75_v7, %v91_v8  ;;  %v96_v13 = vadd.s32 127, %v95_v9 }
  0xb2   :  { %v94_v14 = vor.u32 %v93_v12, %v92_v11  ;;  %v97_v15 = vshll.u32 %v96_v13, 23 }
  0xb4   :  { %v98_v16 = vor.u32 4788187, %v97_v15  ;;  %v101_v18 = vcvt.s32.f32 %v94_v14 }
  0xb6   :  { %v99_v17 = vand.u32 2147483647, %v98_v16 }
  0xb8   :  { %v102_v19 = vmul.f32 %v101_v18, %v99_v17 }
  0xba   :  { %v103_v20 = vxor.u32 2147483648, %v102_v19 }
  0xbc   :  { %v104_v21 = vsel %vm21_vm7, %v103_v20, %v102_v19 }
  0xbd   :  { %v107_v22 = vsel %vm20_vm8, %v189_v5, %v104_v21 }
  0xbe   :  { %153 = vcosq.f32 %v107_v22 }
  0xbf   :  { %155 = vsinq.f32 %v107_v22 }
  0xcb   :  { %v154_v27 = vpop.eup %153 }
  0xcc   :  { %v156_v28 = vpop.eup %155  ;;  %v118_v29 = vxor.u32 2147483648, %v154_v27 }
  0xcd   :  { %v115_v30 = vxor.u32 2147483648, %v156_v28 }
  0xce   :  { %v119_v31 = vsel %vm117_vm9, %v118_v29, %v156_v28 }
  0xcf   :  { %v116_v32 = vsel %vm114_vm10, %v154_v27, %v115_v30 }
  0xd0   :  { %v120_v10 = vsel %vm113_vm11, %v116_v32, %v119_v31 }
  0xd1   :  { %v121_v34 = vsel %vm111_vm12, nan, %v120_v10 }
  0xd2   :  { %v122_v35 = vsub.f32 1.0, %v121_v34 }
  0xd4   :  { %v127_v36 = vmul.f32 %v125_v33, %v122_v35 }
  0xd6   :  { %v128_v37 = vadd.f32 %v127_v36, %v186_v3 }
  0xd8   :  { %130 = vst.msk [vmem:[%s216_s2] sm:$0xff] %vm129_vm13, %v128_v37 }

</bundles_post_ra>
